<compile_context>
chip_gen: v7x
topology: tpu7x:2x2x1
jax: 0.10.0
libtpu: 0.0.40
codegen_flags: <defaults>
</compile_context>

<pallas_src>
import math
import jax
import jax.numpy as jnp
from jax.experimental import pallas as pl
from jax.experimental.pallas import tpu as pltpu

HIDDEN = 32
N_HEADS = 4
HEAD_DIM = HIDDEN // N_HEADS
FFN_DIM = 64
EPS = 1e-6


def encoder_layer_kernel(x_ref, mask_ref,
                         wqkv_ref, wo_ref,
                         gamma_ref, beta_ref,
                         w1_ref, b1_ref, w2_ref, b2_ref,
                         out_ref):
    Bb, S, D = x_ref.shape
    H, Hd = N_HEADS, HEAD_DIM

    x3 = x_ref[...]                              # (Bb, S, D) f32
    gamma = gamma_ref[...]                       # (1, D)
    beta = beta_ref[...]                         # (1, D)

    def mm(a, b):
        # bf16 MXU inputs, f32 accumulation; elementwise math stays f32.
        return jnp.dot(a.astype(jnp.bfloat16), b.astype(jnp.bfloat16),
                       preferred_element_type=jnp.float32)

    def bmm(eq, a, b):
        return jnp.einsum(eq, a.astype(jnp.bfloat16), b.astype(jnp.bfloat16),
                          preferred_element_type=jnp.float32)

    # ------------- fused QKV projection over all Bb*S rows at once -------------
    x2 = x3.reshape(Bb * S, D)
    qkv = mm(x2, wqkv_ref[...])                  # (Bb*S, 3D)
    q3 = qkv[:, 0 * D:1 * D].reshape(Bb, S, D)
    k3 = qkv[:, 1 * D:2 * D].reshape(Bb, S, D)
    v3 = qkv[:, 2 * D:3 * D].reshape(Bb, S, D)

    # --------- heads stacked on a leading batch axis: (H*Bb, S, Hd) ------------
    def split_heads(t3):
        return jnp.concatenate(
            [t3[:, :, h * Hd:(h + 1) * Hd] for h in range(H)], axis=0)

    qh = split_heads(q3)
    kh = split_heads(k3)
    vh = split_heads(v3)

    # additive mask bias computed once, broadcast over heads / query rows
    bias = jnp.where(mask_ref[...] > 0.0, 0.0, -1e9)      # (Bb, 1, S) f32
    bias = jnp.concatenate([bias] * H, axis=0)            # (H*Bb, 1, S)

    scale = 1.0 / math.sqrt(Hd)
    scores = bmm('bqd,bkd->bqk', qh, kh) * scale + bias   # (H*Bb, S, S) f32
    scores = scores - jnp.max(scores, axis=-1, keepdims=True)
    p = jnp.exp(scores)
    p = p * pl.reciprocal(jnp.sum(p, axis=-1, keepdims=True), approx=True)
    ctx = bmm('bqk,bkd->bqd', p, vh)                       # (H*Bb, S, Hd)

    # merge heads back (single lane-axis concatenate) + output projection
    attn = jnp.concatenate([ctx[h * Bb:(h + 1) * Bb] for h in range(H)],
                           axis=-1)                        # (Bb, S, D)
    attn = mm(attn.reshape(Bb * S, D), wo_ref[...])        # (Bb*S, D)

    def layer_norm(t):   # shared params, eps=1e-6, over last dim, all f32
        mu = jnp.mean(t, axis=-1, keepdims=True)
        var = jnp.mean((t - mu) ** 2, axis=-1, keepdims=True)
        return (t - mu) * jax.lax.rsqrt(var + EPS) * gamma + beta

    out1 = x2 + attn
    norm1 = layer_norm(out1)

    # --------------- position-wise FFN (Conv1d k=1 == Linear) ------------------
    h1 = jnp.maximum(mm(norm1, w1_ref[...]) + b1_ref[...], 0.0)
    ffn = mm(h1, w2_ref[...]) + b2_ref[...]

    out_ref[...] = layer_norm(norm1 + ffn).reshape(Bb, S, D)


def encoder_layer(x, mask_f, weights, *, batch_block=None):
    B, S, D = x.shape
    wqkv, wo, gamma, beta, w1, b1, w2, b2 = weights

    if batch_block is None:
        # Tiny batch: fully collapse to one program (per-step overhead dominates).
        # Larger batch: 2 parallel programs so v7x's two TensorCores split it.
        batch_block = B if B < 4 else pl.cdiv(B, 2)
    if B % batch_block != 0:
        batch_block = B
    n_blk = B // batch_block

    def const_spec(shape):
        # Grid-constant weight block. (pl.Buffered(1) would drop the second VMEM
        # buffer; negligible at D=32 so the default double-buffer is kept.)
        return pl.BlockSpec(shape, lambda b: (0,) * len(shape))

    grid_spec = pltpu.PrefetchScalarGridSpec(
        num_scalar_prefetch=0,
        grid=(n_blk,),
        in_specs=[
            pl.BlockSpec((batch_block, S, D), lambda b: (b, 0, 0)),   # x
            pl.BlockSpec((batch_block, 1, S), lambda b: (b, 0, 0)),   # mask
            const_spec(wqkv.shape), const_spec(wo.shape),
            const_spec(gamma.shape), const_spec(beta.shape),
            const_spec(w1.shape), const_spec(b1.shape),
            const_spec(w2.shape), const_spec(b2.shape),
        ],
        out_specs=pl.BlockSpec((batch_block, S, D), lambda b: (b, 0, 0)),
    )
    return pl.pallas_call(
        encoder_layer_kernel,
        out_shape=jax.ShapeDtypeStruct((B, S, D), jnp.float32),
        grid_spec=grid_spec,
        compiler_params=pltpu.CompilerParams(dimension_semantics=("parallel",)),
    )(x, mask_f, wqkv, wo, gamma, beta, w1, b1, w2, b2)


def reference(x, mask_f, weights):
    """Pure-JAX f32 reference of the same forward pass (correctness check)."""
    wq, wk, wv, wo, gamma, beta, w1, b1, w2, b2 = weights
    B, S, D = x.shape
    q = x @ wq; k = x @ wk; v = x @ wv
    qh = q.reshape(B, S, N_HEADS, HEAD_DIM).transpose(0, 2, 1, 3)
    kh = k.reshape(B, S, N_HEADS, HEAD_DIM).transpose(0, 2, 1, 3)
    vh = v.reshape(B, S, N_HEADS, HEAD_DIM).transpose(0, 2, 1, 3)
    scores = jnp.einsum('bhqd,bhkd->bhqk', qh, kh) / math.sqrt(HEAD_DIM)
    m = mask_f[:, None, :, :]                      # (B,1,1,S)
    scores = jnp.where(m > 0.0, scores, -1e9)
    p = jax.nn.softmax(scores, axis=-1)
    attn = jnp.einsum('bhqk,bhkd->bhqd', p, vh).transpose(0, 2, 1, 3).reshape(B, S, D)
    attn = attn @ wo

    def ln(t):
        mu = jnp.mean(t, axis=-1, keepdims=True)
        var = jnp.mean((t - mu) ** 2, axis=-1, keepdims=True)
        return (t - mu) / jnp.sqrt(var + EPS) * gamma + beta

    out1 = ln(x + attn)
    ffn = jnp.maximum(out1 @ w1 + b1, 0.0) @ w2 + b2
    return ln(out1 + ffn)


if __name__ == "__main__":
    B, S, D = 2, 8, HIDDEN
    key = jax.random.PRNGKey(0)
    ks = jax.random.split(key, 10)

    def init(k, shape):
        return (0.02 * jax.random.normal(k, shape)).astype(jnp.float32)

    wq = init(ks[0], (D, D))
    wk = init(ks[1], (D, D))
    wv = init(ks[2], (D, D))
    wo = init(ks[3], (D, D))
    gamma = jnp.ones((1, D), jnp.float32)
    beta = jnp.zeros((1, D), jnp.float32)
    w1 = init(ks[4], (D, FFN_DIM))
    b1 = jnp.zeros((1, FFN_DIM), jnp.float32)
    w2 = init(ks[5], (FFN_DIM, D))
    b2 = jnp.zeros((1, D), jnp.float32)

    # fused QKV + bf16 matmul weights for the kernel; small vectors stay f32
    kernel_weights = (
        jnp.concatenate([wq, wk, wv], axis=1).astype(jnp.bfloat16),  # (D, 3D)
        wo.astype(jnp.bfloat16),
        gamma, beta,
        w1.astype(jnp.bfloat16), b1,
        w2.astype(jnp.bfloat16), b2,
    )
    ref_weights = (wq, wk, wv, wo, gamma, beta, w1, b1, w2, b2)

    x = jax.random.normal(ks[6], (B, S, D), dtype=jnp.float32)

    # source_mask in PyTorch would be [B, 1, 1, S] bool; here: float [B, 1, S]
    lengths = jnp.array([8, 6])
    mask_f = (jnp.arange(S)[None, :] < lengths[:, None]).astype(jnp.float32)
    mask_f = mask_f.reshape(B, 1, S)

    out = encoder_layer(x, mask_f, kernel_weights)
    out = jax.block_until_ready(out)

    ref = reference(x, mask_f, ref_weights)
    # bf16 matmul inputs + approx reciprocal vs the pure-f32 reference -> ~1e-3 deltas
    assert jnp.allclose(out, ref, atol=5e-3, rtol=5e-3), "mismatch vs pure-JAX reference"

    # TODO(synk): dropout layers from the original module are omitted (inference mode).
    print("KERNEL_OK")
</pallas_src>

<mosaic_0001>
module attributes {stable_mosaic.version = 11 : i64} {
  func.func @encoder_layer_kernel(%arg0: i32, %arg1: memref<2x8x32xf32, #tpu.memory_space<vmem>>, %arg2: memref<2x1x8xf32, #tpu.memory_space<vmem>>, %arg3: memref<32x96xbf16, #tpu.memory_space<vmem>>, %arg4: memref<32x32xbf16, #tpu.memory_space<vmem>>, %arg5: memref<1x32xf32, #tpu.memory_space<vmem>>, %arg6: memref<1x32xf32, #tpu.memory_space<vmem>>, %arg7: memref<32x64xbf16, #tpu.memory_space<vmem>>, %arg8: memref<1x64xf32, #tpu.memory_space<vmem>>, %arg9: memref<64x32xbf16, #tpu.memory_space<vmem>>, %arg10: memref<1x32xf32, #tpu.memory_space<vmem>>, %arg11: memref<2x8x32xf32, #tpu.memory_space<vmem>>) attributes {dimension_semantics = [#tpu.dimension_semantics<parallel>], iteration_bounds = array<i64: 1>, scalar_prefetch = 0 : i64, scratch_operands = 0 : i64, tpu.core_type = #tpu.core_type<tc>, window_params = [{transform_indices = @transform_0, window_bounds = array<i64: 2, 8, 32>}, {transform_indices = @transform_1, window_bounds = array<i64: 2, 1, 8>}, {pipeline_mode = #tpu.pipeline_mode<synchronous>, transform_indices = @transform_2, window_bounds = array<i64: 32, 96>}, {pipeline_mode = #tpu.pipeline_mode<synchronous>, transform_indices = @transform_3, window_bounds = array<i64: 32, 32>}, {pipeline_mode = #tpu.pipeline_mode<synchronous>, transform_indices = @transform_4, window_bounds = array<i64: 1, 32>}, {pipeline_mode = #tpu.pipeline_mode<synchronous>, transform_indices = @transform_5, window_bounds = array<i64: 1, 32>}, {pipeline_mode = #tpu.pipeline_mode<synchronous>, transform_indices = @transform_6, window_bounds = array<i64: 32, 64>}, {pipeline_mode = #tpu.pipeline_mode<synchronous>, transform_indices = @transform_7, window_bounds = array<i64: 1, 64>}, {pipeline_mode = #tpu.pipeline_mode<synchronous>, transform_indices = @transform_8, window_bounds = array<i64: 64, 32>}, {pipeline_mode = #tpu.pipeline_mode<synchronous>, transform_indices = @transform_9, window_bounds = array<i64: 1, 32>}, {transform_indices = @transform_10, window_bounds = array<i64: 2, 8, 32>}]} {
    %c0 = arith.constant 0 : index
    %c0_0 = arith.constant 0 : index
    %c0_1 = arith.constant 0 : index
    %0 = vector.load %arg1[%c0, %c0_0, %c0_1] : memref<2x8x32xf32, #tpu.memory_space<vmem>>, vector<2x8x32xf32>
    %c0_2 = arith.constant 0 : index
    %c0_3 = arith.constant 0 : index
    %1 = vector.load %arg5[%c0_2, %c0_3] : memref<1x32xf32, #tpu.memory_space<vmem>>, vector<1x32xf32>
    %c0_4 = arith.constant 0 : index
    %c0_5 = arith.constant 0 : index
    %2 = vector.load %arg6[%c0_4, %c0_5] : memref<1x32xf32, #tpu.memory_space<vmem>>, vector<1x32xf32>
    %3 = vector.shape_cast %0 : vector<2x8x32xf32> to vector<16x32xf32>
    %c0_6 = arith.constant 0 : index
    %c0_7 = arith.constant 0 : index
    %4 = vector.load %arg3[%c0_6, %c0_7] : memref<32x96xbf16, #tpu.memory_space<vmem>>, vector<32x96xbf16>
    %5 = arith.truncf %3 : vector<16x32xf32> to vector<16x32xbf16>
    %cst = arith.constant dense<0.000000e+00> : vector<16x96xf32>
    %6 = tpu.matmul %5, %4, %cst {dimension_numbers = #tpu.dot_dimension_numbers<[1], [0], [0], [1], [0, 0, 1, 1], [], []>} : vector<16x32xbf16>, vector<32x96xbf16>, vector<16x96xf32> -> vector<16x96xf32>
    %7 = vector.extract_strided_slice %6 {offsets = [0, 0], sizes = [16, 32], strides = [1, 1]} : vector<16x96xf32> to vector<16x32xf32>
    %8 = vector.shape_cast %7 : vector<16x32xf32> to vector<2x8x32xf32>
    %9 = vector.extract_strided_slice %6 {offsets = [0, 32], sizes = [16, 32], strides = [1, 1]} : vector<16x96xf32> to vector<16x32xf32>
    %10 = vector.shape_cast %9 : vector<16x32xf32> to vector<2x8x32xf32>
    %11 = vector.extract_strided_slice %6 {offsets = [0, 64], sizes = [16, 32], strides = [1, 1]} : vector<16x96xf32> to vector<16x32xf32>
    %12 = vector.shape_cast %11 : vector<16x32xf32> to vector<2x8x32xf32>
    %13 = vector.extract_strided_slice %8 {offsets = [0, 0, 0], sizes = [2, 8, 8], strides = [1, 1, 1]} : vector<2x8x32xf32> to vector<2x8x8xf32>
    %14 = vector.extract_strided_slice %8 {offsets = [0, 0, 8], sizes = [2, 8, 8], strides = [1, 1, 1]} : vector<2x8x32xf32> to vector<2x8x8xf32>
    %15 = vector.extract_strided_slice %8 {offsets = [0, 0, 16], sizes = [2, 8, 8], strides = [1, 1, 1]} : vector<2x8x32xf32> to vector<2x8x8xf32>
    %16 = vector.extract_strided_slice %8 {offsets = [0, 0, 24], sizes = [2, 8, 8], strides = [1, 1, 1]} : vector<2x8x32xf32> to vector<2x8x8xf32>
    %17 = tpu.concatenate %13, %14, %15, %16 in 0 : vector<2x8x8xf32>, vector<2x8x8xf32>, vector<2x8x8xf32>, vector<2x8x8xf32> -> vector<8x8x8xf32>
    %18 = vector.extract_strided_slice %10 {offsets = [0, 0, 0], sizes = [2, 8, 8], strides = [1, 1, 1]} : vector<2x8x32xf32> to vector<2x8x8xf32>
    %19 = vector.extract_strided_slice %10 {offsets = [0, 0, 8], sizes = [2, 8, 8], strides = [1, 1, 1]} : vector<2x8x32xf32> to vector<2x8x8xf32>
    %20 = vector.extract_strided_slice %10 {offsets = [0, 0, 16], sizes = [2, 8, 8], strides = [1, 1, 1]} : vector<2x8x32xf32> to vector<2x8x8xf32>
    %21 = vector.extract_strided_slice %10 {offsets = [0, 0, 24], sizes = [2, 8, 8], strides = [1, 1, 1]} : vector<2x8x32xf32> to vector<2x8x8xf32>
    %22 = tpu.concatenate %18, %19, %20, %21 in 0 : vector<2x8x8xf32>, vector<2x8x8xf32>, vector<2x8x8xf32>, vector<2x8x8xf32> -> vector<8x8x8xf32>
    %23 = vector.extract_strided_slice %12 {offsets = [0, 0, 0], sizes = [2, 8, 8], strides = [1, 1, 1]} : vector<2x8x32xf32> to vector<2x8x8xf32>
    %24 = vector.extract_strided_slice %12 {offsets = [0, 0, 8], sizes = [2, 8, 8], strides = [1, 1, 1]} : vector<2x8x32xf32> to vector<2x8x8xf32>
    %25 = vector.extract_strided_slice %12 {offsets = [0, 0, 16], sizes = [2, 8, 8], strides = [1, 1, 1]} : vector<2x8x32xf32> to vector<2x8x8xf32>
    %26 = vector.extract_strided_slice %12 {offsets = [0, 0, 24], sizes = [2, 8, 8], strides = [1, 1, 1]} : vector<2x8x32xf32> to vector<2x8x8xf32>
    %27 = tpu.concatenate %23, %24, %25, %26 in 0 : vector<2x8x8xf32>, vector<2x8x8xf32>, vector<2x8x8xf32>, vector<2x8x8xf32> -> vector<8x8x8xf32>
    %c0_8 = arith.constant 0 : index
    %c0_9 = arith.constant 0 : index
    %c0_10 = arith.constant 0 : index
    %28 = vector.load %arg2[%c0_8, %c0_9, %c0_10] : memref<2x1x8xf32, #tpu.memory_space<vmem>>, vector<2x1x8xf32>
    %cst_11 = arith.constant 0.000000e+00 : f32
    %29 = vector.broadcast %cst_11 : f32 to vector<2x1x8xf32>
    %30 = arith.cmpf ogt, %28, %29 : vector<2x1x8xf32>
    %cst_12 = arith.constant 0.000000e+00 : f32
    %cst_13 = arith.constant -1.000000e+09 : f32
    %31 = vector.broadcast %cst_12 : f32 to vector<2x1x8xf32>
    %32 = vector.broadcast %cst_13 : f32 to vector<2x1x8xf32>
    %33 = arith.select %30, %31, %32 : vector<2x1x8xi1>, vector<2x1x8xf32>
    %34 = tpu.concatenate %33, %33, %33, %33 in 0 : vector<2x1x8xf32>, vector<2x1x8xf32>, vector<2x1x8xf32>, vector<2x1x8xf32> -> vector<8x1x8xf32>
    %35 = arith.truncf %17 : vector<8x8x8xf32> to vector<8x8x8xbf16>
    %36 = arith.truncf %22 : vector<8x8x8xf32> to vector<8x8x8xbf16>
    "tpu.trace_start"() <{level = 10 : i32, message = "bqd,bkd->bqk"}> : () -> ()
    %cst_14 = arith.constant dense<0.000000e+00> : vector<8x8x8xf32>
    %37 = tpu.matmul %35, %36, %cst_14 {dimension_numbers = #tpu.dot_dimension_numbers<[2], [2], [1], [1], [0, 0, 0, 1, 1, 1], [0], [0]>} : vector<8x8x8xbf16>, vector<8x8x8xbf16>, vector<8x8x8xf32> -> vector<8x8x8xf32>
    "tpu.trace_stop"() : () -> ()
    %cst_15 = arith.constant 0.353553385 : f32
    %38 = vector.broadcast %cst_15 : f32 to vector<8x8x8xf32>
    %39 = arith.mulf %37, %38 : vector<8x8x8xf32>
    %40 = vector.broadcast %34 : vector<8x1x8xf32> to vector<8x8x8xf32>
    %41 = arith.addf %39, %40 : vector<8x8x8xf32>
    %cst_16 = arith.constant dense<0xFF800000> : vector<8x8xf32>
    %42 = vector.multi_reduction <maximumf>, %41, %cst_16 [2] : vector<8x8x8xf32> to vector<8x8xf32>
    %43 = vector.shape_cast %42 : vector<8x8xf32> to vector<8x8x1xf32>
    %44 = vector.broadcast %43 : vector<8x8x1xf32> to vector<8x8x8xf32>
    %45 = arith.subf %41, %44 : vector<8x8x8xf32>
    %46 = math.exp %45 : vector<8x8x8xf32>
    %cst_17 = arith.constant dense<0.000000e+00> : vector<8x8xf32>
    %47 = vector.multi_reduction <add>, %46, %cst_17 [2] : vector<8x8x8xf32> to vector<8x8xf32>
    %48 = vector.shape_cast %47 : vector<8x8xf32> to vector<8x8x1xf32>
    %49 = tpu.reciprocal %48 {approx = true} : vector<8x8x1xf32> -> vector<8x8x1xf32>
    %50 = vector.broadcast %49 : vector<8x8x1xf32> to vector<8x8x8xf32>
    %51 = arith.mulf %46, %50 : vector<8x8x8xf32>
    %52 = arith.truncf %51 : vector<8x8x8xf32> to vector<8x8x8xbf16>
    %53 = arith.truncf %27 : vector<8x8x8xf32> to vector<8x8x8xbf16>
    "tpu.trace_start"() <{level = 10 : i32, message = "bqk,bkd->bqd"}> : () -> ()
    %cst_18 = arith.constant dense<0.000000e+00> : vector<8x8x8xf32>
    %54 = tpu.matmul %52, %53, %cst_18 {dimension_numbers = #tpu.dot_dimension_numbers<[2], [1], [1], [2], [0, 0, 0, 1, 1, 2], [0], [0]>} : vector<8x8x8xbf16>, vector<8x8x8xbf16>, vector<8x8x8xf32> -> vector<8x8x8xf32>
    "tpu.trace_stop"() : () -> ()
    %55 = vector.extract_strided_slice %54 {offsets = [0, 0, 0], sizes = [2, 8, 8], strides = [1, 1, 1]} : vector<8x8x8xf32> to vector<2x8x8xf32>
    %56 = vector.extract_strided_slice %54 {offsets = [2, 0, 0], sizes = [2, 8, 8], strides = [1, 1, 1]} : vector<8x8x8xf32> to vector<2x8x8xf32>
    %57 = vector.extract_strided_slice %54 {offsets = [4, 0, 0], sizes = [2, 8, 8], strides = [1, 1, 1]} : vector<8x8x8xf32> to vector<2x8x8xf32>
    %58 = vector.extract_strided_slice %54 {offsets = [6, 0, 0], sizes = [2, 8, 8], strides = [1, 1, 1]} : vector<8x8x8xf32> to vector<2x8x8xf32>
    %59 = tpu.concatenate %55, %56, %57, %58 in 2 : vector<2x8x8xf32>, vector<2x8x8xf32>, vector<2x8x8xf32>, vector<2x8x8xf32> -> vector<2x8x32xf32>
    %60 = vector.shape_cast %59 : vector<2x8x32xf32> to vector<16x32xf32>
    %c0_19 = arith.constant 0 : index
    %c0_20 = arith.constant 0 : index
    %61 = vector.load %arg4[%c0_19, %c0_20] : memref<32x32xbf16, #tpu.memory_space<vmem>>, vector<32x32xbf16>
    %62 = arith.truncf %60 : vector<16x32xf32> to vector<16x32xbf16>
    %cst_21 = arith.constant dense<0.000000e+00> : vector<16x32xf32>
    %63 = tpu.matmul %62, %61, %cst_21 {dimension_numbers = #tpu.dot_dimension_numbers<[1], [0], [0], [1], [0, 0, 1, 1], [], []>} : vector<16x32xbf16>, vector<32x32xbf16>, vector<16x32xf32> -> vector<16x32xf32>
    %64 = arith.addf %3, %63 : vector<16x32xf32>
    %cst_22 = arith.constant dense<0.000000e+00> : vector<16xf32>
    %65 = vector.multi_reduction <add>, %64, %cst_22 [1] : vector<16x32xf32> to vector<16xf32>
    %66 = vector.shape_cast %65 : vector<16xf32> to vector<16x1xf32>
    %cst_23 = arith.constant 3.200000e+01 : f32
    %67 = vector.broadcast %cst_23 : f32 to vector<16x1xf32>
    %68 = arith.divf %66, %67 : vector<16x1xf32>
    %69 = vector.broadcast %68 : vector<16x1xf32> to vector<16x32xf32>
    %70 = arith.subf %64, %69 : vector<16x32xf32>
    %71 = arith.mulf %70, %70 : vector<16x32xf32>
    %cst_24 = arith.constant dense<0.000000e+00> : vector<16xf32>
    %72 = vector.multi_reduction <add>, %71, %cst_24 [1] : vector<16x32xf32> to vector<16xf32>
    %73 = vector.shape_cast %72 : vector<16xf32> to vector<16x1xf32>
    %cst_25 = arith.constant 3.200000e+01 : f32
    %74 = vector.broadcast %cst_25 : f32 to vector<16x1xf32>
    %75 = arith.divf %73, %74 : vector<16x1xf32>
    %76 = vector.broadcast %68 : vector<16x1xf32> to vector<16x32xf32>
    %77 = arith.subf %64, %76 : vector<16x32xf32>
    %cst_26 = arith.constant 9.99999997E-7 : f32
    %78 = vector.broadcast %cst_26 : f32 to vector<16x1xf32>
    %79 = arith.addf %75, %78 : vector<16x1xf32>
    %80 = math.rsqrt %79 : vector<16x1xf32>
    %81 = vector.broadcast %80 : vector<16x1xf32> to vector<16x32xf32>
    %82 = arith.mulf %77, %81 : vector<16x32xf32>
    %83 = vector.broadcast %1 : vector<1x32xf32> to vector<16x32xf32>
    %84 = arith.mulf %82, %83 : vector<16x32xf32>
    %85 = vector.broadcast %2 : vector<1x32xf32> to vector<16x32xf32>
    %86 = arith.addf %84, %85 : vector<16x32xf32>
    %c0_27 = arith.constant 0 : index
    %c0_28 = arith.constant 0 : index
    %87 = vector.load %arg7[%c0_27, %c0_28] : memref<32x64xbf16, #tpu.memory_space<vmem>>, vector<32x64xbf16>
    %88 = arith.truncf %86 : vector<16x32xf32> to vector<16x32xbf16>
    %cst_29 = arith.constant dense<0.000000e+00> : vector<16x64xf32>
    %89 = tpu.matmul %88, %87, %cst_29 {dimension_numbers = #tpu.dot_dimension_numbers<[1], [0], [0], [1], [0, 0, 1, 1], [], []>} : vector<16x32xbf16>, vector<32x64xbf16>, vector<16x64xf32> -> vector<16x64xf32>
    %c0_30 = arith.constant 0 : index
    %c0_31 = arith.constant 0 : index
    %90 = vector.load %arg8[%c0_30, %c0_31] : memref<1x64xf32, #tpu.memory_space<vmem>>, vector<1x64xf32>
    %91 = vector.broadcast %90 : vector<1x64xf32> to vector<16x64xf32>
    %92 = arith.addf %89, %91 : vector<16x64xf32>
    %cst_32 = arith.constant 0.000000e+00 : f32
    %93 = vector.broadcast %cst_32 : f32 to vector<16x64xf32>
    %94 = arith.maximumf %92, %93 : vector<16x64xf32>
    %c0_33 = arith.constant 0 : index
    %c0_34 = arith.constant 0 : index
    %95 = vector.load %arg9[%c0_33, %c0_34] : memref<64x32xbf16, #tpu.memory_space<vmem>>, vector<64x32xbf16>
    %96 = arith.truncf %94 : vector<16x64xf32> to vector<16x64xbf16>
    %cst_35 = arith.constant dense<0.000000e+00> : vector<16x32xf32>
    %97 = tpu.matmul %96, %95, %cst_35 {dimension_numbers = #tpu.dot_dimension_numbers<[1], [0], [0], [1], [0, 0, 1, 1], [], []>} : vector<16x64xbf16>, vector<64x32xbf16>, vector<16x32xf32> -> vector<16x32xf32>
    %c0_36 = arith.constant 0 : index
    %c0_37 = arith.constant 0 : index
    %98 = vector.load %arg10[%c0_36, %c0_37] : memref<1x32xf32, #tpu.memory_space<vmem>>, vector<1x32xf32>
    %99 = vector.broadcast %98 : vector<1x32xf32> to vector<16x32xf32>
    %100 = arith.addf %97, %99 : vector<16x32xf32>
    %101 = arith.addf %86, %100 : vector<16x32xf32>
    %cst_38 = arith.constant dense<0.000000e+00> : vector<16xf32>
    %102 = vector.multi_reduction <add>, %101, %cst_38 [1] : vector<16x32xf32> to vector<16xf32>
    %103 = vector.shape_cast %102 : vector<16xf32> to vector<16x1xf32>
    %cst_39 = arith.constant 3.200000e+01 : f32
    %104 = vector.broadcast %cst_39 : f32 to vector<16x1xf32>
    %105 = arith.divf %103, %104 : vector<16x1xf32>
    %106 = vector.broadcast %105 : vector<16x1xf32> to vector<16x32xf32>
    %107 = arith.subf %101, %106 : vector<16x32xf32>
    %108 = arith.mulf %107, %107 : vector<16x32xf32>
    %cst_40 = arith.constant dense<0.000000e+00> : vector<16xf32>
    %109 = vector.multi_reduction <add>, %108, %cst_40 [1] : vector<16x32xf32> to vector<16xf32>
    %110 = vector.shape_cast %109 : vector<16xf32> to vector<16x1xf32>
    %cst_41 = arith.constant 3.200000e+01 : f32
    %111 = vector.broadcast %cst_41 : f32 to vector<16x1xf32>
    %112 = arith.divf %110, %111 : vector<16x1xf32>
    %113 = vector.broadcast %105 : vector<16x1xf32> to vector<16x32xf32>
    %114 = arith.subf %101, %113 : vector<16x32xf32>
    %cst_42 = arith.constant 9.99999997E-7 : f32
    %115 = vector.broadcast %cst_42 : f32 to vector<16x1xf32>
    %116 = arith.addf %112, %115 : vector<16x1xf32>
    %117 = math.rsqrt %116 : vector<16x1xf32>
    %118 = vector.broadcast %117 : vector<16x1xf32> to vector<16x32xf32>
    %119 = arith.mulf %114, %118 : vector<16x32xf32>
    %120 = vector.broadcast %1 : vector<1x32xf32> to vector<16x32xf32>
    %121 = arith.mulf %119, %120 : vector<16x32xf32>
    %122 = vector.broadcast %2 : vector<1x32xf32> to vector<16x32xf32>
    %123 = arith.addf %121, %122 : vector<16x32xf32>
    %124 = vector.shape_cast %123 : vector<16x32xf32> to vector<2x8x32xf32>
    %c0_43 = arith.constant 0 : index
    %c0_44 = arith.constant 0 : index
    %c0_45 = arith.constant 0 : index
    %125 = vector.load %arg11[%c0_43, %c0_44, %c0_45] : memref<2x8x32xf32, #tpu.memory_space<vmem>>, vector<2x8x32xf32>
    tpu.vector_store %arg11[%c0_43, %c0_44, %c0_45], %124 {strides = array<i32>} : memref<2x8x32xf32, #tpu.memory_space<vmem>>, vector<2x8x32xf32>,
    return
  }
  func.func @transform_0(%arg0: i32) -> (i32, i32, i32) {
    %c0_i32 = arith.constant 0 : i32
    %c0_i32_0 = arith.constant 0 : i32
    %c0_i32_1 = arith.constant 0 : i32
    return %arg0, %c0_i32, %c0_i32_0 : i32, i32, i32
  }
  func.func @transform_1(%arg0: i32) -> (i32, i32, i32) {
    %c0_i32 = arith.constant 0 : i32
    %c0_i32_0 = arith.constant 0 : i32
    %c0_i32_1 = arith.constant 0 : i32
    return %arg0, %c0_i32, %c0_i32_0 : i32, i32, i32
  }
  func.func @transform_2(%arg0: i32) -> (i32, i32) {
    %c0_i32 = arith.constant 0 : i32
    %c0_i32_0 = arith.constant 0 : i32
    %c0_i32_1 = arith.constant 0 : i32
    return %c0_i32, %c0_i32_0 : i32, i32
  }
  func.func @transform_3(%arg0: i32) -> (i32, i32) {
    %c0_i32 = arith.constant 0 : i32
    %c0_i32_0 = arith.constant 0 : i32
    %c0_i32_1 = arith.constant 0 : i32
    return %c0_i32, %c0_i32_0 : i32, i32
  }
  func.func @transform_4(%arg0: i32) -> (i32, i32) {
    %c0_i32 = arith.constant 0 : i32
    %c0_i32_0 = arith.constant 0 : i32
    %c0_i32_1 = arith.constant 0 : i32
    return %c0_i32, %c0_i32_0 : i32, i32
  }
  func.func @transform_5(%arg0: i32) -> (i32, i32) {
    %c0_i32 = arith.constant 0 : i32
    %c0_i32_0 = arith.constant 0 : i32
    %c0_i32_1 = arith.constant 0 : i32
    return %c0_i32, %c0_i32_0 : i32, i32
  }
  func.func @transform_6(%arg0: i32) -> (i32, i32) {
    %c0_i32 = arith.constant 0 : i32
    %c0_i32_0 = arith.constant 0 : i32
    %c0_i32_1 = arith.constant 0 : i32
    return %c0_i32, %c0_i32_0 : i32, i32
  }
  func.func @transform_7(%arg0: i32) -> (i32, i32) {
    %c0_i32 = arith.constant 0 : i32
    %c0_i32_0 = arith.constant 0 : i32
    %c0_i32_1 = arith.constant 0 : i32
    return %c0_i32, %c0_i32_0 : i32, i32
  }
  func.func @transform_8(%arg0: i32) -> (i32, i32) {
    %c0_i32 = arith.constant 0 : i32
    %c0_i32_0 = arith.constant 0 : i32
    %c0_i32_1 = arith.constant 0 : i32
    return %c0_i32, %c0_i32_0 : i32, i32
  }
  func.func @transform_9(%arg0: i32) -> (i32, i32) {
    %c0_i32 = arith.constant 0 : i32
    %c0_i32_0 = arith.constant 0 : i32
    %c0_i32_1 = arith.constant 0 : i32
    return %c0_i32, %c0_i32_0 : i32, i32
  }
  func.func @transform_10(%arg0: i32) -> (i32, i32, i32) {
    %c0_i32 = arith.constant 0 : i32
    %c0_i32_0 = arith.constant 0 : i32
    %c0_i32_1 = arith.constant 0 : i32
    return %arg0, %c0_i32, %c0_i32_0 : i32, i32, i32
  }
}

</mosaic_0001>

<bundles_post_ra>
// kernel: tpu_custom_call.1
= control target key start
LH: loop header
LB: loop body
LE: loop exit
PB: predicated region body
PF: predicated region fallthrough
CT: control target
= control target key end

     0   :  { %15 = vsyncpa [#allocation3], 0  ;;  %s2125_s0 = inlined_call_operand.vmem [shape: f32[2,8,32], index: 0, kind: input, shape index: {}]   ;;  %s2126_s1 = inlined_call_operand.vmem [shape: f32[2,1,8], index: 1, kind: input, shape index: {}]   ;;  %s2127_s2 = inlined_call_operand.vmem [shape: bf16[32,96], index: 2, kind: input, shape index: {}]   ;;  %s2128_s3 = inlined_call_operand.vmem [shape: bf16[32,32], index: 3, kind: input, shape index: {}]   ;;  %s2129_s4 = inlined_call_operand.vmem [shape: f32[1,32], index: 4, kind: input, shape index: {}]   ;;  %s2130_s5 = inlined_call_operand.vmem [shape: f32[1,32], index: 5, kind: input, shape index: {}]   ;;  %s2131_s6 = inlined_call_operand.hbm [shape: bf16[32,64], index: 6, kind: input, shape index: {}]   ;;  %s2132_s7 = inlined_call_operand.vmem [shape: f32[1,64], index: 7, kind: input, shape index: {}]   ;;  %s2133_s8 = inlined_call_operand.vmem [shape: bf16[64,32], index: 8, kind: input, shape index: {}]   ;;  %s2134_s9 = inlined_call_operand.vmem [shape: f32[1,32], index: 9, kind: input, shape index: {}]   ;;  %s2135_s10 = inlined_call_operand.hbm [shape: f32[2,8,32], index: 10, kind: output, shape index: {}]  }
   0x1   :  { %16 = vsyncpa [#allocation4], 0  ;;  %s1752_s13 = smov [#allocation2]   ;;  %s1704_s17 = scalar_lea.hbm %s2131_s6, 256 }
   0x2   :  { %s34_s14 = sshll.u32 %s1752_s13, 4  ;;  %p1705_p0 = scmp.ne.s32.totalorder %s2131_s6, %s1704_s17  ;;  %s35_s14 = int_to_ptr.vmem [resolvable:$true] %s34_s14 }
   0x3   :  { %p1708_p1 = scmp.lt.u32.totalorder %s1704_s17, %s2131_s6 }
   0x5   :  { %p1710_p2 = pnand %p1708_p1, %p1705_p0 }
   0x7   :  { %1713 = shalt.err (!%p1710_p2)
}
   0x8   :  { %s1714_s22 = scalar_lea.vmem %s35_s14, 256  ;;  %p1719_p4 = scmp.lt.s32.totalorder %s35_s14, %s35_s14 }
   0x9   :  { %p1715_p3 = scmp.ne.s32.totalorder %s35_s14, %s1714_s22  ;;  %p1720_p5 = scmp.lt.s32.totalorder %s1714_s22, %s1714_s22 }
   0xb   :  { %p1721_p6 = por %p1720_p5, %p1719_p4 }
   0xd   :  { %p1722_p7 = pnand %p1721_p6, %p1715_p3 }
   0xf   :  { %1725 = shalt.err (!%p1722_p7)
}
  0x10   :  { %s1753_s23 = smov 64   ;;  %s1754_s24 = smov 4  }
  0x11   :  { %40 = dma.hbm_to_vmem [thread:$0]  %s2131_s6, 256, %s35_s14, [#allocation3], %s1753_s23, %s1753_s23, %s1754_s24  }
  0x12   :  { %1748 = dma.done.wait [#allocation3], 256  }
  0x13   :  { %1749 = vsyncadd [#allocation3], 4294967040  ;;  %v1755_v0 = vmov 0.0   ;;  %vm1756_vm0 = vmmov 0   ;;  %v1654_v1 = vld [vmem:[%s2127_s2] sm:$0xff]   ;;  %v1655_v2 = vld [vmem:[%s2127_s2 + $0x8] sm:$0xff]   ;;  %v554_v48 = vlaneseq }
  0x14   :  { %1477 = vmatprep.subr.bf16.mxu0 %v1755_v0  ;;  %1481 = vmatprep.mubr.msk.bf16.mxu0 %vm1756_vm0, %v1755_v0  ;;  %v1851_v3 = vld [vmem:[%s2125_s0] sm:$0xff]  ;;  %v1856_v4 = vld [vmem:[%s2125_s0 + $0x8] sm:$0xff]  ;;  %vm72_vm1 = vcmask 261120   ;;  %s1757_s0 = smov 104   ;;  %s1758_s2 = smov 120   ;;  %vm154_vm2 = vcmask 64512  }
  0x15   :  { %1485 = vmatprep.subr.bf16.mxu1 %v1755_v0  ;;  %1487 = vmatprep.mubr.msk.bf16.mxu1 %vm1756_vm0, %v1755_v0  ;;  %v59_v5 = vpack.c.bf16 %v1856_v4, %v1851_v3  ;;  %s1759_s14 = smov 96   ;;  %s1760_s15 = smov 112   ;;  %vm673_vm3 = vcmask 1043456   ;;  %v137_v49 = vld [vmem:[%s2126_s1] sm:$0x1]  ;;  %v555_v50 = vshrl.u32 %v554_v48, 7 }
  0x16   :  { %1478 = vmatpush3.bf16.msra.mxu0 %v1654_v1  ;;  %vm139_vm4 = vcmp.gt.f32.partialorder %v137_v49, 0.0  ;;  %v138_v51 = vld [vmem:[%s2126_s1 + $0x1] sm:$0x1]  ;;  %v1761_v53 = vmov -1e+09   ;;  %s1762_s1 = smov 8  }
  0x17   :  { %1479 = vmatprep.subr.bf16.mxu0 %v1755_v0  ;;  %v556_v52 = vsub.s32 0, %v555_v50  ;;  %v141_v54 = vsel %vm139_vm4, 0.0, %v1761_v53  ;;  %vm140_vm5 = vcmp.gt.f32.partialorder %v138_v51, 0.0  ;;  %s1763_s24 = smov 16   ;;  %s1764_s25 = smov 24   ;;  %vm1079_vm6 = vcmask 130048  }
  0x18   :  { %v142_v57 = vsel %vm140_vm5, 0.0, %v1761_v53  ;;  %vm1082_vm7 = vcmask 195584   ;;  %vm1301_vm8 = vcmask 523264  }
  0x19   :  { %v557_v55 = vrot.slane %v141_v54, %v556_v52  ;;  %v561_v63 = vrot.slane %v142_v57, %v556_v52 }
  0x1a   :  { %1480 = vmatpush3.bf16.msra.mxu0 %v1655_v2 }
  0x1b   :  { %1491 = vmatprep.subr.bf16.mxu0 %v1755_v0 }
  0x1d   :  { %1482 = vmatmul.mubr.msk.bf16.vlgmr.msra.gmra.mrb[0].mxu0 %vm72_vm1, %v59_v5 }
  0x1e   :  { %1493 = vmatprep.mubr.msk.bf16.mxu0 %vm1756_vm0, %v1755_v0 }
  0xf0   :  { %v110_v6 = vpop.f32.mrb[0].mxu0 }
  0xf1   :  { %v1483_v7 = vpop.f32.mrb[1].mxu0  ;;  %v143_v11 = vpack.c.bf16 %v110_v6, %v110_v6 }
  0xf2   :  { %v113_v8 = vpop.f32.mrb[2].mxu0 }
  0xf3   :  { %v1484_v9 = vpop.f32.mrb[3].mxu0  ;;  %v1634_v10 = vpack.i.bf16 %v113_v8, %v110_v6  ;;  %v144_v12 = vpack.c.bf16 %v113_v8, %v113_v8 }
  0xf5   :  { %1635 = vrot.lane.b32.xlu1 %v1634_v10, %s1757_s0  ;;  %1625 = vrot.lane.b32.xlu0 %v1634_v10, %s1758_s2 }
  0xf9   :  { %152 = vrot.lane.b32.xlu1 %v143_v11, %s1759_s14  ;;  %1630 = vrot.lane.b32.xlu0 %v1634_v10, %s1760_s15 }
  0xfd   :  { %202 = vrot.lane.b32.xlu0 %v144_v12, %s1759_s14 }
 0x167   :  { %v1636_v13 = vpop.permute.xlu1 %1635  ;;  %v1626_v14 = vpop.permute.xlu0 %1625 }
 0x168   :  { %v1628_v15 = vunpack.i.h.bf16 %v1626_v14  ;;  %v1627_v16 = vunpack.i.l.bf16 %v1626_v14  ;;  %v1637_v24 = vunpack.i.l.bf16 %v1636_v13  ;;  %v1638_v27 = vunpack.i.h.bf16 %v1636_v13 }
 0x16a   :  { %v1867_v17 = vpack.c.bf16 %v1628_v15, %v1628_v15  ;;  %v1869_v18 = vpack.c.bf16 %v1627_v16, %v1627_v16  ;;  %v1886_v30 = vpack.c.bf16 %v1637_v24, %v1637_v24  ;;  %v1889_v31 = vpack.c.bf16 %v1638_v27, %v1638_v27 }
 0x16b   :  { %v153_v19 = vpop.permute.xlu1 %152  ;;  %v1631_v20 = vpop.permute.xlu0 %1630 }
 0x16c   :  { %v1633_v21 = vunpack.i.h.bf16 %v1631_v20  ;;  %v1632_v22 = vunpack.i.l.bf16 %v1631_v20  ;;  %251 = vrot.lane.b32.xlu1 %v1869_v18, %s1759_s14  ;;  %300 = vrot.lane.b32.xlu0 %v1867_v17, %s1759_s14  ;;  %v159_v23 = vsel %vm154_vm2, %v153_v19, 0 }
 0x16d   :  { %1486 = vmatpush3.bf16.xpose.msra.mxu1 %v159_v23 }
 0x16e   :  { %v1876_v25 = vpack.c.bf16 %v1633_v21, %v1633_v21  ;;  %v1878_v26 = vpack.c.bf16 %v1632_v22, %v1632_v22  ;;  %1497 = vmatprep.subr.bf16.mxu1 %v1755_v0 }
 0x16f   :  { %v203_v28 = vpop.permute.xlu0 %202 }
 0x170   :  { %v208_v29 = vsel %vm154_vm2, %v203_v28, 0  ;;  %349 = vrot.lane.b32.xlu1 %v1878_v26, %s1759_s14  ;;  %398 = vrot.lane.b32.xlu0 %v1876_v25, %s1759_s14 }
 0x171   :  { %1492 = vmatpush3.bf16.xpose.msra.mxu0 %v208_v29 }
 0x172   :  { %1503 = vmatprep.subr.bf16.mxu0 %v1755_v0 }
 0x174   :  { %1488 = vmatmul.mubr.msk.bf16.vlgmr.msra.gmra.mrb[0].mxu1 %vm154_vm2, %v143_v11  ;;  %447 = vrot.lane.b32.xlu1 %v1886_v30, %s1759_s14 }
 0x175   :  { %496 = vrot.lane.b32.xlu0 %v1889_v31, %s1759_s14  ;;  %1499 = vmatprep.mubr.msk.bf16.mxu1 %vm1756_vm0, %v1755_v0 }
 0x178   :  { %717 = vrot.lane.b32.xlu1 %v144_v12, %s1753_s23  ;;  %1494 = vmatmul.mubr.msk.bf16.vlgmr.msra.gmra.mrb[4].mxu0 %vm154_vm2, %v144_v12 }
 0x179   :  { %668 = vrot.lane.b32.xlu0 %v143_v11, %s1753_s23  ;;  %1505 = vmatprep.mubr.msk.bf16.mxu0 %vm1756_vm0, %v1755_v0 }
 0x1de   :  { %v252_v32 = vpop.permute.xlu1 %251  ;;  %v301_v33 = vpop.permute.xlu0 %300 }
 0x1df   :  { %v257_v34 = vsel %vm154_vm2, %v252_v32, 0  ;;  %v306_v35 = vsel %vm154_vm2, %v301_v33, 0 }
 0x1e0   :  { %1498 = vmatpush3.bf16.xpose.msra.mxu1 %v257_v34  ;;  %1504 = vmatpush3.bf16.xpose.msra.mxu0 %v306_v35 }
 0x1e1   :  { %1509 = vmatprep.subr.bf16.mxu1 %v1755_v0  ;;  %1515 = vmatprep.subr.bf16.mxu0 %v1755_v0 }
 0x1e2   :  { %v350_v36 = vpop.permute.xlu1 %349  ;;  %v399_v37 = vpop.permute.xlu0 %398 }
 0x1e3   :  { %v355_v38 = vsel %vm154_vm2, %v350_v36, 0  ;;  %v404_v39 = vsel %vm154_vm2, %v399_v37, 0 }
 0x1e6   :  { %v448_v40 = vpop.permute.xlu1 %447 }
 0x1e7   :  { %1500 = vmatmul.mubr.msk.bf16.vlgmr.msra.gmra.mrb[4].mxu1 %vm154_vm2, %v1869_v18  ;;  %1506 = vmatmul.mubr.msk.bf16.vlgmr.msra.gmra.mrb[8].mxu0 %vm154_vm2, %v1867_v17  ;;  %v497_v41 = vpop.permute.xlu0 %496  ;;  %v453_v42 = vsel %vm154_vm2, %v448_v40, 0 }
 0x1e8   :  { %1510 = vmatpush3.bf16.xpose.msra.mxu1 %v355_v38  ;;  %1516 = vmatpush3.bf16.xpose.msra.mxu0 %v404_v39  ;;  %v502_v43 = vsel %vm154_vm2, %v497_v41, 0 }
 0x1e9   :  { %1511 = vmatprep.mubr.msk.bf16.mxu1 %vm1756_vm0, %v1755_v0  ;;  %1517 = vmatprep.mubr.msk.bf16.mxu0 %vm1756_vm0, %v1755_v0 }
 0x1ea   :  { %1521 = vmatprep.subr.bf16.mxu1 %v1755_v0  ;;  %1527 = vmatprep.subr.bf16.mxu0 %v1755_v0  ;;  %v718_v44 = vpop.permute.xlu1 %717 }
 0x1eb   :  { %v669_v45 = vpop.permute.xlu0 %668  ;;  %v723_v46 = vsel %vm673_vm3, %v718_v44, 0 }
 0x1ec   :  { %v675_v47 = vsel %vm673_vm3, %v669_v45, 0 }
 0x1ef   :  { %1512 = vmatmul.mubr.msk.bf16.vlgmr.msra.gmra.mrb[8].mxu1 %vm154_vm2, %v1878_v26  ;;  %1518 = vmatmul.mubr.msk.bf16.vlgmr.msra.gmra.mrb[12].mxu0 %vm154_vm2, %v1876_v25 }
 0x1f0   :  { %1522 = vmatpush3.bf16.xpose.msra.mxu1 %v453_v42  ;;  %1528 = vmatpush3.bf16.xpose.msra.mxu0 %v502_v43 }
 0x1f1   :  { %1523 = vmatprep.mubr.msk.bf16.mxu1 %vm1756_vm0, %v1755_v0  ;;  %1529 = vmatprep.mubr.msk.bf16.mxu0 %vm1756_vm0, %v1755_v0 }
 0x1f2   :  { %1533 = vmatprep.subr.bf16.mxu1 %v1755_v0  ;;  %1539 = vmatprep.subr.bf16.mxu0 %v1755_v0 }
 0x1f7   :  { %1524 = vmatmul.mubr.msk.bf16.vlgmr.msra.gmra.mrb[12].mxu1 %vm154_vm2, %v1886_v30  ;;  %1530 = vmatmul.mubr.msk.bf16.vlgmr.msra.gmra.mrb[16].mxu0 %vm154_vm2, %v1889_v31 }
 0x1f8   :  { %1534 = vmatpush3.bf16.msra.mxu1 %v675_v47  ;;  %1540 = vmatpush3.bf16.msra.mxu0 %v723_v46 }
 0x1f9   :  { %1535 = vmatprep.mubr.msk.bf16.mxu1 %vm1756_vm0, %v1755_v0  ;;  %1541 = vmatprep.mubr.msk.bf16.mxu0 %vm1756_vm0, %v1755_v0 }
 0x1fa   :  { %1545 = vmatprep.subr.bf16.mxu1 %v1755_v0  ;;  %1551 = vmatprep.subr.bf16.mxu0 %v1755_v0 }
 0x247   :  { %v195_v56 = vpop.f32.mrb[0].mxu1 }
 0x248   :  { %v544_v58 = vmul.f32 0.35355338, %v195_v56  ;;  %v1489_v59 = vpop.f32.mrb[1].mxu1 }
 0x249   :  { %v198_v60 = vpop.f32.mrb[2].mxu1 }
 0x24a   :  { %v1490_v61 = vpop.f32.mrb[3].mxu1  ;;  %v1949_v62 = vadd.f32 %v557_v55, %v544_v58 }
 0x24b   :  { %v244_v1 = vpop.f32.mrb[4].mxu0 }
 0x24c   :  { %v545_v2 = vmul.f32 0.35355338, %v244_v1  ;;  %v1495_v5 = vpop.f32.mrb[5].mxu0  ;;  %v572_v6 = vsel %vm154_vm2, %v1949_v62, -inf }
 0x24d   :  { %573 = vmax.xlane.f32.xlu1 %v572_v6  ;;  %v247_v7 = vpop.f32.mrb[6].mxu0 }
 0x24e   :  { %v1496_v8 = vpop.f32.mrb[7].mxu0  ;;  %v565_v9 = vadd.f32 %v561_v63, %v545_v2 }
 0x250   :  { %v575_v10 = vsel %vm154_vm2, %v565_v9, -inf }
 0x251   :  { %576 = vmax.xlane.f32.xlu0 %v575_v10 }
 0x2ba   :  { %v293_v11 = vpop.f32.mrb[4].mxu1  ;;  %v342_v12 = vpop.f32.mrb[8].mxu0 }
 0x2bb   :  { %v546_v13 = vmul.f32 0.35355338, %v293_v11  ;;  %v547_v14 = vmul.f32 0.35355338, %v342_v12  ;;  %v1501_v15 = vpop.f32.mrb[5].mxu1  ;;  %v1507_v16 = vpop.f32.mrb[9].mxu0 }
 0x2bc   :  { %v296_v19 = vpop.f32.mrb[6].mxu1  ;;  %v345_v20 = vpop.f32.mrb[10].mxu0 }
 0x2bd   :  { %v1502_v21 = vpop.f32.mrb[7].mxu1  ;;  %v1508_v22 = vpop.f32.mrb[11].mxu0  ;;  %v566_v23 = vadd.f32 %v557_v55, %v546_v13  ;;  %v567_v24 = vadd.f32 %v561_v63, %v547_v14 }
 0x2bf   :  { %v578_v27 = vsel %vm154_vm2, %v566_v23, -inf  ;;  %v581_v28 = vsel %vm154_vm2, %v567_v24, -inf }
 0x2c0   :  { %579 = vmax.xlane.f32.xlu0 %v578_v27  ;;  %582 = vmax.xlane.f32.xlu1 %v581_v28 }
 0x2c2   :  { %v391_v29 = vpop.f32.mrb[8].mxu1  ;;  %v440_v32 = vpop.f32.mrb[12].mxu0 }
 0x2c3   :  { %v548_v33 = vmul.f32 0.35355338, %v391_v29  ;;  %v549_v34 = vmul.f32 0.35355338, %v440_v32  ;;  %v1513_v35 = vpop.f32.mrb[9].mxu1  ;;  %v1519_v36 = vpop.f32.mrb[13].mxu0 }
 0x2c4   :  { %v394_v37 = vpop.f32.mrb[10].mxu1  ;;  %v443_v38 = vpop.f32.mrb[14].mxu0 }
 0x2c5   :  { %v1514_v39 = vpop.f32.mrb[11].mxu1  ;;  %v1520_v40 = vpop.f32.mrb[15].mxu0  ;;  %v1956_v41 = vadd.f32 %v557_v55, %v548_v33  ;;  %v569_v42 = vadd.f32 %v561_v63, %v549_v34 }
 0x2c7   :  { %v584_v43 = vsel %vm154_vm2, %v1956_v41, -inf  ;;  %v587_v44 = vsel %vm154_vm2, %v569_v42, -inf }
 0x2c8   :  { %585 = vmax.xlane.f32.xlu0 %v584_v43  ;;  %588 = vmax.xlane.f32.xlu1 %v587_v44 }
 0x2ca   :  { %v489_v45 = vpop.f32.mrb[12].mxu1  ;;  %v538_v46 = vpop.f32.mrb[16].mxu0 }
 0x2cb   :  { %v550_v47 = vmul.f32 0.35355338, %v489_v45  ;;  %v551_v48 = vmul.f32 0.35355338, %v538_v46  ;;  %v1525_v49 = vpop.f32.mrb[13].mxu1  ;;  %v1531_v50 = vpop.f32.mrb[17].mxu0 }
 0x2cc   :  { %v492_v51 = vpop.f32.mrb[14].mxu1  ;;  %v541_v52 = vpop.f32.mrb[18].mxu0 }
 0x2cd   :  { %v1526_v53 = vpop.f32.mrb[15].mxu1  ;;  %v1532_v54 = vpop.f32.mrb[19].mxu0  ;;  %v570_v56 = vadd.f32 %v557_v55, %v550_v47  ;;  %v571_v57 = vadd.f32 %v561_v63, %v551_v48 }
 0x2cf   :  { %v590_v58 = vsel %vm154_vm2, %v570_v56, -inf  ;;  %v593_v59 = vsel %vm154_vm2, %v571_v57, -inf }
 0x2d0   :  { %591 = vmax.xlane.f32.xlu0 %v590_v58  ;;  %594 = vmax.xlane.f32.xlu1 %v593_v59 }
 0x2da   :  { %v574_v60 = vpop.xlane.xlu1 %573 }
 0x2db   :  { %v596_v1 = vsub.f32 %v1949_v62, %v574_v60 }
 0x2dd   :  { %v604_v5 = vmul.f32 1.442695, %v596_v1 }
 0x2de   :  { %v577_v61 = vpop.xlane.xlu0 %576 }
 0x2df   :  { %v597_v2 = vsub.f32 %v565_v9, %v577_v61  ;;  %1664 = vpow2.f32 %v604_v5 }
 0x2e1   :  { %765 = vrot.lane.b32.xlu1 %v1869_v18, %s1753_s23  ;;  %v606_v55 = vmul.f32 1.442695, %v597_v2 }
 0x2e3   :  { %1666 = vpow2.f32 %v606_v55 }
 0x2e6   :  { %813 = vrot.lane.b32.xlu0 %v1867_v17, %s1753_s23 }
 0x2e9   :  { %v1665_v63 = vpop.eup %1664 }
 0x2ea   :  { %v620_v7 = vsel %vm154_vm2, %v1665_v63, 0.0 }
 0x2ed   :  { %v1667_v6 = vpop.eup %1666 }
 0x2ee   :  { %v623_v8 = vsel %vm154_vm2, %v1667_v6, 0.0 }
 0x305   :  { %621 = vadd.xlane.f32.xlu0 %v620_v7  ;;  %624 = vadd.xlane.f32.xlu1 %v623_v8 }
 0x316   :  { %861 = vrot.lane.b32.xlu1 %v1878_v26, %s1753_s23 }
 0x34d   :  { %v580_v17 = vpop.xlane.xlu0 %579  ;;  %v583_v18 = vpop.xlane.xlu1 %582 }
 0x34e   :  { %v598_v10 = vsub.f32 %v566_v23, %v580_v17  ;;  %v599_v62 = vsub.f32 %v567_v24, %v583_v18 }
 0x350   :  { %v608_v9 = vmul.f32 1.442695, %v598_v10  ;;  %v610_v11 = vmul.f32 1.442695, %v599_v62 }
 0x352   :  { %1668 = vpow2.f32 %v608_v9 }
 0x353   :  { %1670 = vpow2.f32 %v610_v11 }
 0x355   :  { %v589_v12 = vpop.xlane.xlu1 %588  ;;  %v586_v29 = vpop.xlane.xlu0 %585 }
 0x356   :  { %v601_v13 = vsub.f32 %v569_v42, %v589_v12  ;;  %v600_v32 = vsub.f32 %v1956_v41, %v586_v29 }
 0x358   :  { %v614_v14 = vmul.f32 1.442695, %v601_v13  ;;  %v612_v34 = vmul.f32 1.442695, %v600_v32 }
 0x35a   :  { %1672 = vpow2.f32 %v614_v14 }
 0x35c   :  { %v1972_v15 = vpop.eup %1668 }
 0x35d   :  { %v1974_v16 = vpop.eup %1670  ;;  %v595_v19 = vpop.xlane.xlu1 %594  ;;  %v626_v26 = vsel %vm154_vm2, %v1972_v15, 0.0 }
 0x35e   :  { %v603_v20 = vsub.f32 %v571_v57, %v595_v19  ;;  %627 = vadd.xlane.f32.xlu0 %v626_v26  ;;  %v629_v21 = vsel %vm154_vm2, %v1974_v16, 0.0  ;;  %v592_v33 = vpop.xlane.xlu0 %591 }
 0x35f   :  { %630 = vadd.xlane.f32.xlu1 %v629_v21  ;;  %v602_v35 = vsub.f32 %v570_v56, %v592_v33 }
 0x360   :  { %v618_v22 = vmul.f32 1.442695, %v603_v20 }
 0x361   :  { %v616_v36 = vmul.f32 1.442695, %v602_v35  ;;  %v766_v38 = vpop.permute.xlu1 %765 }
 0x362   :  { %1674 = vpow2.f32 %v618_v22  ;;  %v814_v37 = vpop.permute.xlu0 %813  ;;  %v771_v49 = vsel %vm673_vm3, %v766_v38, 0 }
 0x363   :  { %1676 = vpow2.f32 %v612_v34  ;;  %v819_v50 = vsel %vm673_vm3, %v814_v37, 0 }
 0x364   :  { %v1980_v23 = vpop.eup %1672  ;;  %1678 = vpow2.f32 %v616_v36 }
 0x365   :  { %v635_v24 = vsel %vm154_vm2, %v1980_v23, 0.0 }
 0x366   :  { %636 = vadd.xlane.f32.xlu1 %v635_v24 }
 0x36c   :  { %v1984_v27 = vpop.eup %1674 }
 0x36d   :  { %v641_v28 = vsel %vm154_vm2, %v1984_v27, 0.0  ;;  %v1993_v39 = vpop.eup %1676 }
 0x36e   :  { %642 = vadd.xlane.f32.xlu1 %v641_v28  ;;  %v1997_v43 = vpop.eup %1678 }
 0x374   :  { %909 = vrot.lane.b32.xlu0 %v1876_v25, %s1753_s23  ;;  %v632_v25 = vsel %vm154_vm2, %v1993_v39, 0.0 }
 0x37f   :  { %957 = vrot.lane.b32.xlu1 %v1886_v30, %s1753_s23  ;;  %v638_v30 = vsel %vm154_vm2, %v1997_v43, 0.0 }
 0x392   :  { %v622_v40 = vpop.xlane.xlu0 %621  ;;  %v625_v42 = vpop.xlane.xlu1 %624 }
 0x393   :  { %1680 = vrcp.f32 %v622_v40  ;;  %633 = vadd.xlane.f32.xlu0 %v632_v25 }
 0x394   :  { %1682 = vrcp.f32 %v625_v42 }
 0x396   :  { %v862_v51 = vpop.permute.xlu1 %861 }
 0x397   :  { %639 = vadd.xlane.f32.xlu0 %v638_v30  ;;  %v867_v2 = vsel %vm673_vm3, %v862_v51, 0 }
 0x39d   :  { %v1681_v41 = vpop.eup %1680 }
 0x39e   :  { %v1683_v44 = vpop.eup %1682  ;;  %v652_v45 = vmul.f32 %v1681_v41, %v1665_v63  ;;  %v1656_v41 = vld [vmem:[%s2128_s3] sm:$0xff]  }
 0x39f   :  { %v653_v46 = vmul.f32 %v1683_v44, %v1667_v6 }
 0x3a0   :  { %v660_v47 = vpack.c.bf16 %v652_v45, %v652_v45 }
 0x3a1   :  { %v661_v48 = vpack.c.bf16 %v653_v46, %v653_v46 }
 0x3a2   :  { %1536 = vmatmul.mubr.msk.bf16.vlgmr.msra.gmra.mrb[16].mxu1 %vm154_vm2, %v660_v47 }
 0x3a3   :  { %1542 = vmatmul.mubr.msk.bf16.vlgmr.msra.gmra.mrb[20].mxu0 %vm154_vm2, %v661_v48  ;;  %1546 = vmatpush3.bf16.msra.mxu1 %v771_v49  ;;  %v1657_v49 = vld [vmem:[%s2128_s3 + $0x8] sm:$0xff]  }
 0x3a4   :  { %1552 = vmatpush3.bf16.msra.mxu0 %v819_v50  ;;  %1547 = vmatprep.mubr.msk.bf16.mxu1 %vm1756_vm0, %v1755_v0 }
 0x3a5   :  { %1553 = vmatprep.mubr.msk.bf16.mxu0 %vm1756_vm0, %v1755_v0  ;;  %1557 = vmatprep.subr.bf16.mxu1 %v1755_v0 }
 0x3a6   :  { %1563 = vmatprep.subr.bf16.mxu0 %v1755_v0 }
 0x3ad   :  { %1005 = vrot.lane.b32.xlu0 %v1889_v31, %s1753_s23 }
 0x3eb   :  { %v628_v52 = vpop.xlane.xlu0 %627 }
 0x3ec   :  { %1684 = vrcp.f32 %v628_v52  ;;  %v631_v53 = vpop.xlane.xlu1 %630 }
 0x3ed   :  { %1686 = vrcp.f32 %v631_v53 }
 0x3ef   :  { %v910_v60 = vpop.permute.xlu0 %909 }
 0x3f0   :  { %v915_v31 = vsel %vm673_vm3, %v910_v60, 0 }
 0x3f3   :  { %v637_v54 = vpop.xlane.xlu1 %636 }
 0x3f4   :  { %1688 = vrcp.f32 %v637_v54 }
 0x3f6   :  { %v1685_v56 = vpop.eup %1684 }
 0x3f7   :  { %v1687_v57 = vpop.eup %1686  ;;  %v654_v58 = vmul.f32 %v1685_v56, %v1972_v15 }
 0x3f8   :  { %v655_v59 = vmul.f32 %v1687_v57, %v1974_v16 }
 0x3f9   :  { %v662_v61 = vpack.c.bf16 %v654_v58, %v654_v58 }
 0x3fa   :  { %v663_v1 = vpack.c.bf16 %v655_v59, %v655_v59 }
 0x3fb   :  { %1548 = vmatmul.mubr.msk.bf16.vlgmr.msra.gmra.mrb[20].mxu1 %vm154_vm2, %v662_v61  ;;  %v643_v6 = vpop.xlane.xlu1 %642 }
 0x3fc   :  { %1554 = vmatmul.mubr.msk.bf16.vlgmr.msra.gmra.mrb[24].mxu0 %vm154_vm2, %v663_v1  ;;  %1558 = vmatpush3.bf16.msra.mxu1 %v867_v2  ;;  %1690 = vrcp.f32 %v643_v6 }
 0x3fd   :  { %1564 = vmatpush3.bf16.msra.mxu0 %v915_v31  ;;  %1565 = vmatprep.mubr.msk.bf16.mxu0 %vm1756_vm0, %v1755_v0 }
 0x3fe   :  { %1575 = vmatprep.subr.bf16.mxu0 %v1755_v0  ;;  %1559 = vmatprep.mubr.msk.bf16.mxu1 %vm1756_vm0, %v1755_v0  ;;  %v1689_v5 = vpop.eup %1688 }
 0x3ff   :  { %1569 = vmatprep.subr.bf16.mxu1 %v1755_v0  ;;  %v657_v55 = vmul.f32 %v1689_v5, %v1980_v23  ;;  %v958_v13 = vpop.permute.xlu1 %957 }
 0x400   :  { %v963_v16 = vsel %vm673_vm3, %v958_v13, 0 }
 0x401   :  { %v665_v63 = vpack.c.bf16 %v657_v55, %v657_v55 }
 0x404   :  { %1566 = vmatmul.mubr.msk.bf16.vlgmr.msra.gmra.mrb[28].mxu0 %vm154_vm2, %v665_v63 }
 0x405   :  { %1577 = vmatprep.mubr.msk.bf16.mxu0 %vm1756_vm0, %v1755_v0 }
 0x406   :  { %v1691_v8 = vpop.eup %1690 }
 0x407   :  { %v659_v18 = vmul.f32 %v1691_v8, %v1984_v27 }
 0x409   :  { %v667_v11 = vpack.c.bf16 %v659_v18, %v659_v18 }
 0x420   :  { %v634_v7 = vpop.xlane.xlu0 %633 }
 0x421   :  { %1692 = vrcp.f32 %v634_v7 }
 0x424   :  { %v640_v17 = vpop.xlane.xlu0 %639 }
 0x425   :  { %1694 = vrcp.f32 %v640_v17 }
 0x428   :  { %v1006_v10 = vpop.permute.xlu0 %1005 }
 0x429   :  { %v1011_v62 = vsel %vm673_vm3, %v1006_v10, 0 }
 0x42a   :  { %1576 = vmatpush3.bf16.msra.mxu0 %v1011_v62 }
 0x42b   :  { %v1693_v9 = vpop.eup %1692  ;;  %1589 = vmatprep.subr.bf16.mxu0 %v1755_v0 }
 0x42c   :  { %v656_v12 = vmul.f32 %v1693_v9, %v1993_v39 }
 0x42d   :  { %1578 = vmatmul.mubr.msk.bf16.vlgmr.msra.gmra.mrb[32].mxu0 %vm154_vm2, %v667_v11 }
 0x42e   :  { %v664_v14 = vpack.c.bf16 %v656_v12, %v656_v12  ;;  %1593 = vmatprep.mubr.msk.bf16.mxu0 %vm1756_vm0, %v1755_v0 }
 0x42f   :  { %v1695_v15 = vpop.eup %1694 }
 0x430   :  { %1560 = vmatmul.mubr.msk.bf16.vlgmr.msra.gmra.mrb[24].mxu1 %vm154_vm2, %v664_v14  ;;  %v658_v19 = vmul.f32 %v1695_v15, %v1997_v43 }
 0x431   :  { %1570 = vmatpush3.bf16.msra.mxu1 %v963_v16  ;;  %1571 = vmatprep.mubr.msk.bf16.mxu1 %vm1756_vm0, %v1755_v0 }
 0x432   :  { %1581 = vmatprep.subr.bf16.mxu1 %v1755_v0  ;;  %v666_v26 = vpack.c.bf16 %v658_v19, %v658_v19 }
 0x438   :  { %1572 = vmatmul.mubr.msk.bf16.vlgmr.msra.gmra.mrb[28].mxu1 %vm154_vm2, %v666_v26 }
 0x439   :  { %1585 = vmatprep.mubr.msk.bf16.mxu1 %vm1756_vm0, %v1755_v0  ;;  %1582 = vmatpush3.bf16.msra.mxu1 %v1656_v41 }
 0x43a   :  { %1583 = vmatprep.subr.bf16.mxu1 %v1755_v0 }
 0x43d   :  { %1584 = vmatpush3.bf16.msra.mxu1 %v1657_v49 }
 0x43e   :  { %1597 = vmatprep.subr.bf16.mxu1 %v1755_v0 }
 0x475   :  { %v711_v20 = vpop.f32.mrb[16].mxu1 }
 0x476   :  { %v759_v21 = vpop.f32.mrb[20].mxu0  ;;  %v1537_v22 = vpop.f32.mrb[17].mxu1 }
 0x477   :  { %v1543_v23 = vpop.f32.mrb[21].mxu0  ;;  %v714_v24 = vpop.f32.mrb[18].mxu1 }
 0x478   :  { %v762_v27 = vpop.f32.mrb[22].mxu0  ;;  %v1538_v28 = vpop.f32.mrb[19].mxu1 }
 0x479   :  { %v1544_v29 = vpop.f32.mrb[23].mxu0 }
 0x4ce   :  { %v807_v32 = vpop.f32.mrb[20].mxu1 }
 0x4cf   :  { %v855_v33 = vpop.f32.mrb[24].mxu0  ;;  %v1549_v34 = vpop.f32.mrb[21].mxu1 }
 0x4d0   :  { %v1639_v35 = vpack.i.bf16 %v855_v33, %v807_v32  ;;  %v1555_v36 = vpop.f32.mrb[25].mxu0  ;;  %v810_v37 = vpop.f32.mrb[22].mxu1  ;;  %v1658_v32 = vld [vmem:[#allocation2] sm:$0xff]   ;;  %v1659_v33 = vld [vmem:[#allocation2 + $0x8] sm:$0xff]  }
 0x4d1   :  { %v858_v38 = vpop.f32.mrb[26].mxu0  ;;  %v1550_v39 = vpop.f32.mrb[23].mxu1  ;;  %1590 = vmatpush3.bf16.msra.mxu0 %v1658_v32  ;;  %v1660_v34 = vld [vmem:[%s2133_s8] sm:$0xff]  }
 0x4d2   :  { %1640 = vrot.lane.b32.xlu1 %v1639_v35, %s1762_s1  ;;  %v1556_v40 = vpop.f32.mrb[27].mxu0  ;;  %1591 = vmatprep.subr.bf16.mxu0 %v1755_v0  ;;  %v1661_v35 = vld [vmem:[%s2133_s8 + $0x8] sm:$0xff]  }
 0x4d5   :  { %1592 = vmatpush3.bf16.msra.mxu0 %v1659_v33 }
 0x4d7   :  { %v951_v42 = vpop.f32.mrb[28].mxu0 }
 0x4d8   :  { %v1567_v25 = vpop.f32.mrb[29].mxu0 }
 0x4d9   :  { %v954_v43 = vpop.f32.mrb[30].mxu0 }
 0x4da   :  { %v1568_v30 = vpop.f32.mrb[31].mxu0 }
 0x4db   :  { %v2077_v30 = vld [vmem:[%s2129_s4] ss:$0 sm:$0xff] }
 0x500   :  { %v1047_v44 = vpop.f32.mrb[32].mxu0 }
 0x501   :  { %v1579_v45 = vpop.f32.mrb[33].mxu0 }
 0x502   :  { %v1050_v46 = vpop.f32.mrb[34].mxu0 }
 0x503   :  { %v903_v47 = vpop.f32.mrb[24].mxu1  ;;  %v1580_v48 = vpop.f32.mrb[35].mxu0  ;;  %v2083_v46 = vld [vmem:[%s2130_s5] ss:$0 sm:$0xff] }
 0x504   :  { %v1644_v50 = vpack.i.bf16 %v951_v42, %v903_v47  ;;  %v1561_v51 = vpop.f32.mrb[25].mxu1 }
 0x505   :  { %v906_v52 = vpop.f32.mrb[26].mxu1  ;;  %v1662_v51 = vld [vmem:[%s2133_s8 + $0x10] sm:$0xff]  }
 0x506   :  { %v1562_v53 = vpop.f32.mrb[27].mxu1  ;;  %1645 = vrot.lane.b32.xlu0 %v1644_v50, %s1763_s24  ;;  %v1663_v52 = vld [vmem:[%s2133_s8 + $0x18] sm:$0xff]  }
 0x507   :  { %v1421_v53 = vld [vmem:[%s2132_s7] ss:$0 sm:$0xff]  ;;  %s1765_s7 = smov [#allocation5]  }
 0x508   :  { %s1385_s8 = sshll.u32 %s1765_s7, 4  ;;  %s1386_s8 = int_to_ptr.vmem [resolvable:$true] %s1385_s8 }
 0x509   :  { %p1731_p9 = scmp.lt.s32.totalorder %s1386_s8, %s1386_s8 }
 0x50b   :  { %v999_v54 = vpop.f32.mrb[28].mxu1 }
 0x50c   :  { %v1649_v56 = vpack.i.bf16 %v1047_v44, %v999_v54  ;;  %v1573_v57 = vpop.f32.mrb[29].mxu1 }
 0x50d   :  { %v1002_v58 = vpop.f32.mrb[30].mxu1 }
 0x50e   :  { %v1574_v59 = vpop.f32.mrb[31].mxu1  ;;  %1650 = vrot.lane.b32.xlu1 %v1649_v56, %s1764_s25 }
 0x544   :  { %v1641_v60 = vpop.permute.xlu1 %1640 }
 0x545   :  { %v1643_v1 = vunpack.i.h.bf16 %v1641_v60  ;;  %v1642_v2 = vunpack.i.l.bf16 %v1641_v60 }
 0x547   :  { %v1078_v63 = vsel %vm154_vm2, %v759_v21, %v1643_v1  ;;  %v1077_v6 = vsel %vm154_vm2, %v711_v20, %v1642_v2 }
 0x578   :  { %v1646_v61 = vpop.permute.xlu0 %1645 }
 0x579   :  { %v1648_v31 = vunpack.i.h.bf16 %v1646_v61  ;;  %v1647_v5 = vunpack.i.l.bf16 %v1646_v61 }
 0x57b   :  { %v1081_v17 = vsel %vm1079_vm6, %v1078_v63, %v1648_v31  ;;  %v1080_v18 = vsel %vm1079_vm6, %v1077_v6, %v1647_v5 }
 0x580   :  { %v1651_v55 = vpop.permute.xlu1 %1650 }
 0x581   :  { %v1653_v7 = vunpack.i.h.bf16 %v1651_v55  ;;  %v1652_v8 = vunpack.i.l.bf16 %v1651_v55 }
 0x583   :  { %v1084_v10 = vsel %vm1082_vm7, %v1081_v17, %v1653_v7  ;;  %v1083_v62 = vsel %vm1082_vm7, %v1080_v18, %v1652_v8 }
 0x584   :  { %v1089_v9 = vpack.c.bf16 %v1084_v10, %v1083_v62 }
 0x586   :  { %1586 = vmatmul.mubr.msk.bf16.vlgmr.msra.gmra.mrb[32].mxu1 %vm72_vm1, %v1089_v9 }
 0x587   :  { %1605 = vmatprep.mubr.msk.bf16.mxu1 %vm1756_vm0, %v1755_v0  ;;  %1598 = vmatpush3.bf16.msra.mxu1 %v1660_v34 }
 0x588   :  { %1599 = vmatprep.subr.bf16.mxu1 %v1755_v0 }
 0x58b   :  { %1600 = vmatpush3.bf16.msra.mxu1 %v1661_v35 }
 0x58c   :  { %1601 = vmatprep.subr.bf16.mxu1 %v1755_v0 }
 0x58f   :  { %1602 = vmatpush3.bf16.msra.mxu1 %v1662_v51 }
 0x590   :  { %1603 = vmatprep.subr.bf16.mxu1 %v1755_v0  ;;  %v1425_v0 = vld [vmem:[%s2134_s9] ss:$0 sm:$0xff]  ;;  %s1726_s9 = scalar_lea.vmem %s1386_s8, 256 }
 0x591   :  { %p1727_p8 = scmp.ne.s32.totalorder %s1386_s8, %s1726_s9  ;;  %p1732_p10 = scmp.lt.s32.totalorder %s1726_s9, %s1726_s9 }
 0x593   :  { %1604 = vmatpush3.bf16.msra.mxu1 %v1663_v52  ;;  %p1733_p11 = por %p1732_p10, %p1731_p9 }
 0x595   :  { %p1734_p12 = pnand %p1733_p11, %p1727_p8 }
 0x659   :  { %v1139_v11 = vpop.f32.mrb[32].mxu1 }
 0x65a   :  { %v1146_v12 = vadd.f32 %v1139_v11, %v1851_v3  ;;  %v1587_v13 = vpop.f32.mrb[33].mxu1 }
 0x65b   :  { %v1142_v14 = vpop.f32.mrb[34].mxu1 }
 0x65c   :  { %v1147_v15 = vadd.f32 %v1142_v14, %v1856_v4  ;;  %v1588_v16 = vpop.f32.mrb[35].mxu1  ;;  %v1148_v19 = vsel %vm72_vm1, %v1146_v12, 0.0 }
 0x65d   :  { %1149 = vadd.xlane.f32.xlu0 %v1148_v19 }
 0x65e   :  { %v1151_v26 = vsel %vm72_vm1, %v1147_v15, 0.0 }
 0x65f   :  { %1152 = vadd.xlane.f32.xlu1 %v1151_v26 }
 0x6ea   :  { %v1150_v20 = vpop.xlane.xlu0 %1149 }
 0x6eb   :  { %v1155_v21 = vmul.f32 0.03125, %v1150_v20 }
 0x6ec   :  { %v1153_v22 = vpop.xlane.xlu1 %1152 }
 0x6ed   :  { %v1157_v23 = vsub.f32 %v1146_v12, %v1155_v21  ;;  %v1156_v24 = vmul.f32 0.03125, %v1153_v22 }
 0x6ef   :  { %v1158_v27 = vsub.f32 %v1147_v15, %v1156_v24  ;;  %v1159_v28 = vmul.f32 %v1157_v23, %v1157_v23 }
 0x6f1   :  { %v1161_v3 = vsel %vm72_vm1, %v1159_v28, 0.0  ;;  %v1160_v29 = vmul.f32 %v1158_v27, %v1158_v27 }
 0x6f2   :  { %1162 = vadd.xlane.f32.xlu0 %v1161_v3 }
 0x6f3   :  { %v1164_v4 = vsel %vm72_vm1, %v1160_v29, 0.0 }
 0x6f6   :  { %1165 = vadd.xlane.f32.xlu0 %v1164_v4 }
 0x77f   :  { %v1163_v36 = vpop.xlane.xlu0 %1162 }
 0x780   :  { %v1167_v37 = vmul.f32 0.03125, %v1163_v36 }
 0x782   :  { %v1169_v38 = vadd.f32 1e-06, %v1167_v37 }
 0x783   :  { %v1166_v39 = vpop.xlane.xlu0 %1165 }
 0x784   :  { %1696 = vrsqrt.f32 %v1169_v38  ;;  %v1168_v40 = vmul.f32 0.03125, %v1166_v39 }
 0x786   :  { %v1170_v42 = vadd.f32 1e-06, %v1168_v40 }
 0x788   :  { %1698 = vrsqrt.f32 %v1170_v42 }
 0x78e   :  { %v1697_v25 = vpop.eup %1696 }
 0x78f   :  { %v1173_v43 = vmul.f32 %v1697_v25, %v1157_v23 }
 0x791   :  { %v1181_v44 = vmul.f32 %v2077_v30, %v1173_v43 }
 0x792   :  { %v1699_v41 = vpop.eup %1698 }
 0x793   :  { %v1174_v45 = vmul.f32 %v1699_v41, %v1158_v27  ;;  %v1189_v48 = vadd.f32 %v2083_v46, %v1181_v44 }
 0x795   :  { %v1182_v47 = vmul.f32 %v2077_v30, %v1174_v45 }
 0x797   :  { %v1190_v49 = vadd.f32 %v2083_v46, %v1182_v47 }
 0x799   :  { %v1195_v50 = vpack.c.bf16 %v1190_v49, %v1189_v48 }
 0x79b   :  { %1594 = vmatmul.mubr.msk.bf16.vlgmr.msra.gmra.mrb[36].mxu0 %vm72_vm1, %v1195_v50 }
 0x86e   :  { %v1252_v54 = vpop.f32.mrb[36].mxu0 }
 0x86f   :  { %v1253_v56 = vadd.f32 %v1421_v53, %v1252_v54  ;;  %v1595_v57 = vpop.f32.mrb[37].mxu0 }
 0x870   :  { %v1255_v58 = vpop.f32.mrb[38].mxu0 }
 0x871   :  { %v1256_v59 = vadd.f32 %v1421_v53, %v1255_v58  ;;  %v1596_v60 = vpop.f32.mrb[39].mxu0  ;;  %v1259_v61 = vmax.f32 %v1253_v56, 0.0 }
 0x873   :  { %v1260_v1 = vmax.f32 %v1256_v59, 0.0 }
 0x875   :  { %v1269_v2 = vpack.c.bf16 %v1260_v1, %v1259_v61 }
 0x877   :  { %1606 = vmatmul.mubr.msk.bf16.vlgmr.msra.gmra.mrb[36].mxu1 %vm1301_vm8, %v1269_v2 }
 0x94a   :  { %v1339_v31 = vpop.f32.mrb[36].mxu1 }
 0x94b   :  { %v1340_v5 = vadd.f32 %v1425_v0, %v1339_v31  ;;  %v1607_v55 = vpop.f32.mrb[37].mxu1 }
 0x94c   :  { %v1342_v63 = vpop.f32.mrb[38].mxu1 }
 0x94d   :  { %v1343_v6 = vadd.f32 %v1425_v0, %v1342_v63  ;;  %v1608_v7 = vpop.f32.mrb[39].mxu1  ;;  %v1346_v8 = vadd.f32 %v1340_v5, %v1189_v48 }
 0x94f   :  { %v1348_v17 = vsel %vm72_vm1, %v1346_v8, 0.0  ;;  %v1347_v18 = vadd.f32 %v1343_v6, %v1190_v49 }
 0x950   :  { %1349 = vadd.xlane.f32.xlu1 %v1348_v17 }
 0x951   :  { %v1351_v10 = vsel %vm72_vm1, %v1347_v18, 0.0 }
 0x952   :  { %1352 = vadd.xlane.f32.xlu0 %v1351_v10 }
 0x9dd   :  { %v1350_v62 = vpop.xlane.xlu1 %1349 }
 0x9de   :  { %v1354_v9 = vmul.f32 0.03125, %v1350_v62 }
 0x9df   :  { %v1353_v11 = vpop.xlane.xlu0 %1352 }
 0x9e0   :  { %v1356_v12 = vsub.f32 %v1346_v8, %v1354_v9  ;;  %v1355_v13 = vmul.f32 0.03125, %v1353_v11 }
 0x9e2   :  { %v1357_v14 = vsub.f32 %v1347_v18, %v1355_v13  ;;  %v1358_v15 = vmul.f32 %v1356_v12, %v1356_v12 }
 0x9e4   :  { %v1360_v16 = vsel %vm72_vm1, %v1358_v15, 0.0  ;;  %v1359_v19 = vmul.f32 %v1357_v14, %v1357_v14 }
 0x9e5   :  { %1361 = vadd.xlane.f32.xlu1 %v1360_v16 }
 0x9e6   :  { %v1363_v26 = vsel %vm72_vm1, %v1359_v19, 0.0 }
 0x9e7   :  { %1364 = vadd.xlane.f32.xlu0 %v1363_v26 }
 0xa72   :  { %v1362_v20 = vpop.xlane.xlu1 %1361 }
 0xa73   :  { %v1366_v21 = vmul.f32 0.03125, %v1362_v20 }
 0xa74   :  { %v1365_v22 = vpop.xlane.xlu0 %1364 }
 0xa75   :  { %v1368_v23 = vadd.f32 1e-06, %v1366_v21  ;;  %v1367_v24 = vmul.f32 0.03125, %v1365_v22 }
 0xa77   :  { %1700 = vrsqrt.f32 %v1368_v23  ;;  %v1369_v27 = vadd.f32 1e-06, %v1367_v24 }
 0xa79   :  { %1702 = vrsqrt.f32 %v1369_v27 }
 0xa81   :  { %v1701_v28 = vpop.eup %1700 }
 0xa82   :  { %v1372_v3 = vmul.f32 %v1701_v28, %v1356_v12 }
 0xa83   :  { %v1703_v29 = vpop.eup %1702 }
 0xa84   :  { %v1374_v4 = vmul.f32 %v2077_v30, %v1372_v3  ;;  %v1373_v32 = vmul.f32 %v1703_v29, %v1357_v14 }
 0xa86   :  { %v1375_v33 = vmul.f32 %v2077_v30, %v1373_v32  ;;  %v1376_v34 = vadd.f32 %v2083_v46, %v1374_v4 }
 0xa88   :  { %v1377_v35 = vadd.f32 %v2083_v46, %v1375_v33  ;;  %1378 = vst.msk [vmem:[#allocation5] sm:$0xff] %vm72_vm1, %v1376_v34 }
 0xa8a   :  { %1379 = vst.msk [vmem:[#allocation5 + $0x8] sm:$0xff] %vm72_vm1, %v1377_v35 }
 0xa8b   :  { %1737 = shalt.err (!%p1734_p12)
}
 0xa8c   :  { %s1738_s18 = scalar_lea.hbm %s2135_s10, 256 }
 0xa8d   :  { %p1739_p13 = scmp.ne.s32.totalorder %s2135_s10, %s1738_s18  ;;  %p1742_p0 = scmp.lt.u32.totalorder %s1738_s18, %s2135_s10 }
 0xa8f   :  { %p1744_p1 = pnand %p1742_p0, %p1739_p13 }
 0xa91   :  { %1747 = shalt.err (!%p1744_p1)
}
 0xa92   :  { %s1766_s23 = smov 128  }
 0xa93   :  { %1391 = dma.vmem_to_hbm [thread:$0]  %s1386_s8, 256, %s2135_s10, [#allocation4], %s1766_s23, %s1766_s23, %s1762_s1  }
 0xa94   :  { %1750 = dma.done.wait [#allocation4], 256  }
 0xa95   :  { %1751 = vsyncadd [#allocation4], 4294967040 }
 0xa96   :  { %1395 = vsyncpa [#allocation3], 1 }
 0xa97   :  { %1396 = vsyncpa [#allocation4], 1 }

</bundles_post_ra>
